<compile_context>
chip_gen: v7x
topology: tpu7x:2x2x1
jax: 0.10.0
libtpu: 0.0.40
codegen_flags: <defaults>
</compile_context>

<pallas_src>
import functools

import jax
import jax.numpy as jnp
from jax.experimental import pallas as pl
from jax.experimental.pallas import tpu as pltpu


def _biasfree_ln_kernel(x_ref, w_ref, o_ref, *, eps, axis):
    """BiasFree LayerNorm on one VMEM tile.

    axis = 0: x_ref is (C, tile_tokens)  -- channels on sublanes (lane-dense path)
    axis = 1: x_ref is (tile_tokens, C)  -- channels on lanes (C % 128 == 0 path)
    w_ref broadcasts along the non-reduced axis.
    """
    x = x_ref[...].astype(jnp.float32)
    mu = jnp.mean(x, axis=axis, keepdims=True)
    var = jnp.mean(jnp.square(x - mu), axis=axis, keepdims=True)
    # BiasFree: numerator is x itself (no mean subtraction), no bias term.
    y = x * jax.lax.rsqrt(var + eps) * w_ref[...].astype(jnp.float32)
    o_ref[...] = y.astype(o_ref.dtype)


def _round_up(n, m):
    return (n + m - 1) // m * m


def _pick_tile(m, unit, cap):
    """Multiple of `unit`, <= cap, covering m; prefer >=2 grid steps (2 TCs on v7x)."""
    t = min(cap, _round_up(m, unit))
    if m > unit and pl.cdiv(m, t) < 2:
        t = max(unit, _round_up(pl.cdiv(m, 2), unit))
    return t


def biasfree_layernorm(x, weight, eps=1e-5):
    """PyTorch BiasFree_LayerNorm.forward: normalize over the last axis of x."""
    orig_shape = x.shape
    C = int(orig_shape[-1])
    M = 1
    for d in orig_shape[:-1]:
        M *= int(d)
    xf = x.reshape(M, C)

    if C % 128 == 0:
        # Channels already fill whole lanes: keep the natural layout and
        # reduce over the lane axis.
        tile = _pick_tile(M, 8, 2048)
        Mp = _round_up(M, tile)
        if Mp != M:
            xf = jnp.pad(xf, ((0, Mp - M), (0, 0)))
        out = pl.pallas_call(
            functools.partial(_biasfree_ln_kernel, eps=eps, axis=1),
            out_shape=jax.ShapeDtypeStruct((Mp, C), x.dtype),
            grid=(Mp // tile,),
            in_specs=[
                pl.BlockSpec((tile, C), lambda i: (i, 0)),
                pl.BlockSpec((1, C), lambda i: (0, 0)),
            ],
            out_specs=pl.BlockSpec((tile, C), lambda i: (i, 0)),
            compiler_params=pltpu.CompilerParams(
                dimension_semantics=("parallel",)),
        )(xf, weight.reshape(1, C))
        return out[:M].reshape(orig_shape)

    # Small C: transpose so the long token axis sits on the 128 lanes
    # (lane-dense loads/stores) and the C-reduction runs over sublanes.
    xt = xf.T                                   # (C, M) -- XLA-side layout plumbing
    tile = _pick_tile(M, 128, 4096)
    Mp = _round_up(M, tile)
    if Mp != M:
        xt = jnp.pad(xt, ((0, 0), (0, Mp - M)))
    out = pl.pallas_call(
        functools.partial(_biasfree_ln_kernel, eps=eps, axis=0),
        out_shape=jax.ShapeDtypeStruct((C, Mp), x.dtype),
        grid=(Mp // tile,),
        in_specs=[
            pl.BlockSpec((C, tile), lambda i: (0, i)),
            pl.BlockSpec((C, 1), lambda i: (0, 0)),
        ],
        out_specs=pl.BlockSpec((C, tile), lambda i: (0, i)),
        compiler_params=pltpu.CompilerParams(
            dimension_semantics=("parallel",)),
    )(xt, weight.reshape(C, 1))
    return out[:, :M].T.reshape(orig_shape)


if __name__ == "__main__":
    # The module is applied (inside the transformer block) to to_3d(x), i.e.
    # a (B, H*W, C) tensor with channels last; shapes here are small but
    # representative of that usage.
    B, H, W, C = 2, 16, 16, 32
    key = jax.random.PRNGKey(0)
    kx, kw = jax.random.split(key)
    x = jax.random.normal(kx, (B, H * W, C), jnp.float32)
    # The module initializes weight = ones; perturb it deterministically so the
    # per-channel scale is actually exercised.
    weight = 1.0 + 0.1 * jax.random.normal(kw, (C,), jnp.float32)

    y = jax.jit(biasfree_layernorm)(x, weight)
    jax.block_until_ready(y)

    # Reference: x / sqrt(x.var(-1, keepdim=True, unbiased=False) + 1e-5) * weight
    sigma = jnp.var(x, axis=-1, keepdims=True)
    ref = x / jnp.sqrt(sigma + 1e-5) * weight
    assert y.shape == x.shape and y.dtype == x.dtype
    assert bool(jnp.all(jnp.isfinite(y)))
    assert bool(jnp.allclose(y, ref, atol=1e-4, rtol=1e-4))
    print("KERNEL_OK")
</pallas_src>

<mosaic_0001>
module attributes {stable_mosaic.version = 11 : i64} {
  func.func @_biasfree_ln_kernel(%arg0: i32, %arg1: memref<32x256xf32, #tpu.memory_space<vmem>>, %arg2: memref<32x1xf32, #tpu.memory_space<vmem>>, %arg3: memref<32x256xf32, #tpu.memory_space<vmem>>) attributes {dimension_semantics = [#tpu.dimension_semantics<parallel>], iteration_bounds = array<i64: 2>, scalar_prefetch = 0 : i64, scratch_operands = 0 : i64, tpu.core_type = #tpu.core_type<tc>, window_params = [{transform_indices = @transform_0, window_bounds = array<i64: 32, 256>}, {pipeline_mode = #tpu.pipeline_mode<synchronous>, transform_indices = @transform_1, window_bounds = array<i64: 32, 1>}, {transform_indices = @transform_2, window_bounds = array<i64: 32, 256>}]} {
    %c0 = arith.constant 0 : index
    %c0_0 = arith.constant 0 : index
    %0 = vector.load %arg1[%c0, %c0_0] : memref<32x256xf32, #tpu.memory_space<vmem>>, vector<32x256xf32>
    %cst = arith.constant dense<0.000000e+00> : vector<256xf32>
    %1 = vector.multi_reduction <add>, %0, %cst [0] : vector<32x256xf32> to vector<256xf32>
    %2 = vector.shape_cast %1 : vector<256xf32> to vector<1x256xf32>
    %cst_1 = arith.constant 3.200000e+01 : f32
    %3 = vector.broadcast %cst_1 : f32 to vector<1x256xf32>
    %4 = arith.divf %2, %3 : vector<1x256xf32>
    %5 = vector.broadcast %4 : vector<1x256xf32> to vector<32x256xf32>
    %6 = arith.subf %0, %5 : vector<32x256xf32>
    %7 = arith.mulf %6, %6 : vector<32x256xf32>
    %cst_2 = arith.constant dense<0.000000e+00> : vector<256xf32>
    %8 = vector.multi_reduction <add>, %7, %cst_2 [0] : vector<32x256xf32> to vector<256xf32>
    %9 = vector.shape_cast %8 : vector<256xf32> to vector<1x256xf32>
    %cst_3 = arith.constant 3.200000e+01 : f32
    %10 = vector.broadcast %cst_3 : f32 to vector<1x256xf32>
    %11 = arith.divf %9, %10 : vector<1x256xf32>
    %cst_4 = arith.constant 9.99999974E-6 : f32
    %12 = vector.broadcast %cst_4 : f32 to vector<1x256xf32>
    %13 = arith.addf %11, %12 : vector<1x256xf32>
    %14 = math.rsqrt %13 : vector<1x256xf32>
    %15 = vector.broadcast %14 : vector<1x256xf32> to vector<32x256xf32>
    %16 = arith.mulf %0, %15 : vector<32x256xf32>
    %c0_5 = arith.constant 0 : index
    %c0_6 = arith.constant 0 : index
    %17 = vector.load %arg2[%c0_5, %c0_6] : memref<32x1xf32, #tpu.memory_space<vmem>>, vector<32x1xf32>
    %18 = vector.broadcast %17 : vector<32x1xf32> to vector<32x256xf32>
    %19 = arith.mulf %16, %18 : vector<32x256xf32>
    %c0_7 = arith.constant 0 : index
    %c0_8 = arith.constant 0 : index
    %20 = vector.load %arg3[%c0_7, %c0_8] : memref<32x256xf32, #tpu.memory_space<vmem>>, vector<32x256xf32>
    tpu.vector_store %arg3[%c0_7, %c0_8], %19 {strides = array<i32>} : memref<32x256xf32, #tpu.memory_space<vmem>>, vector<32x256xf32>,
    return
  }
  func.func @transform_0(%arg0: i32) -> (i32, i32) {
    %c0_i32 = arith.constant 0 : i32
    %c0_i32_0 = arith.constant 0 : i32
    return %c0_i32, %arg0 : i32, i32
  }
  func.func @transform_1(%arg0: i32) -> (i32, i32) {
    %c0_i32 = arith.constant 0 : i32
    %c0_i32_0 = arith.constant 0 : i32
    %c0_i32_1 = arith.constant 0 : i32
    return %c0_i32, %c0_i32_0 : i32, i32
  }
  func.func @transform_2(%arg0: i32) -> (i32, i32) {
    %c0_i32 = arith.constant 0 : i32
    %c0_i32_0 = arith.constant 0 : i32
    return %c0_i32, %arg0 : i32, i32
  }
}

</mosaic_0001>

<bundles_post_ra>
// kernel: biasfree_layernorm.1
= control target key start
LH: loop header
LB: loop body
LE: loop exit
PB: predicated region body
PF: predicated region fallthrough
CT: control target
= control target key end

     0   :  { %s476_s9 = smov 0   ;;  %s478_s10 = smov 0   ;;  %s610_s0 = inlined_call_operand.vmem [shape: f32[32,512], index: 0, kind: input, shape index: {}]   ;;  %s611_s1 = inlined_call_operand.vmem [shape: f32[32,1], index: 1, kind: input, shape index: {}]   ;;  %s612_s2 = inlined_call_operand.vmem [shape: f32[32,512], index: 2, kind: output, shape index: {}]  }
   0x1   :  { %s480_s11 = smov 0  }
   0x2 LB: > { %s388_s12 = sadd.s32 4294967295, %s458_s11   ;;  %s493_s13 = sadd.s32 1, %s458_s11   ;;  %s458_s11 = sphi %s480_s11, %s616_s11   ;;  %s454_s10 = sphi %s478_s10, %s615_s10   ;;  %s450_s9 = sphi %s476_s9, %s614_s9  }
   0x3   : > { %s16_s14 = ssub.s32 %s458_s11, %s493_s13  ;;  %s19_s15 = sadd.s32 1, %s454_s10 }
   0x4   : > { %p17_p0 = scmp.eq.s32.totalorder %s16_s14, 0  ;;  %p26_p1 = scmp.ne.s32.totalorder %s454_s10, %s450_s9 }
   0x5   : > { %p27_p2 = scmp.eq.s32.totalorder %s458_s11, 0  ;;  %p77_p3 = scmp.eq.s32.totalorder %s388_s12, 1 }
   0x6   : > { %s504_s16 = scalar_select %p17_p0, %s454_s10, %s19_s15  }
   0x7   : > { %p28_p4 = por %p27_p2, %p26_p1  ;;  %p506_p5 = por %p77_p3, %p26_p1 }
   0x8   : > { %p391_p6 = scmp.ge.s32.totalorder %s458_s11, 2 }
   0xa   : > { %102 = sbr.rel (%p391_p6) target bundleno = 25 (0x19), region = 20 }
  0x11   : > { %105 = sbr.rel (!%p28_p4) target bundleno = 25 (0x19), region = 24  ;;  %s107_s18 = sand.u32 (%p28_p4), 1, %s454_s10  }
  0x12   : > { %s403_s19 = sshll.u32 (%p28_p4), %s458_s11, 4  ;;  %s392_s20 = sshll.u32 (%p28_p4), %s107_s18, 6 }
  0x13   : > { %s112_s23 = scalar_lea.vmem (%p28_p4), %s610_s0, %s403_s19  ;;  %s109_s24 = scalar_lea.vmem (%p28_p4), [#allocation2], %s392_s20 }
  0x14   : > { %v125_v0 = vld [vmem:[%s112_s23] sm:$0xff] (%p28_p4)  ;;  %v127_v1 = vld [vmem:[%s112_s23 + $0x8] sm:$0xff] (%p28_p4) }
  0x15   : > { %v129_v2 = vld [vmem:[%s112_s23 + $0x20] sm:$0xff] (%p28_p4)  ;;  %126 = vst [vmem:[%s109_s24] sm:$0xff] (%p28_p4), %v125_v0  ;;  %128 = vst [vmem:[%s109_s24 + $0x8] sm:$0xff] (%p28_p4), %v127_v1  ;;  %v131_v3 = vld [vmem:[%s112_s23 + $0x28] sm:$0xff] (%p28_p4) }
  0x16   : > { %130 = vst [vmem:[%s109_s24 + $0x10] sm:$0xff] (%p28_p4), %v129_v2  ;;  %v133_v4 = vld [vmem:[%s112_s23 + $0x40] sm:$0xff] (%p28_p4)  ;;  %v135_v5 = vld [vmem:[%s112_s23 + $0x48] sm:$0xff] (%p28_p4)  ;;  %132 = vst [vmem:[%s109_s24 + $0x18] sm:$0xff] (%p28_p4), %v131_v3 }
  0x17   : > { %134 = vst [vmem:[%s109_s24 + $0x20] sm:$0xff] (%p28_p4), %v133_v4  ;;  %136 = vst [vmem:[%s109_s24 + $0x28] sm:$0xff] (%p28_p4), %v135_v5  ;;  %v137_v6 = vld [vmem:[%s112_s23 + $0x60] sm:$0xff] (%p28_p4)  ;;  %v139_v7 = vld [vmem:[%s112_s23 + $0x68] sm:$0xff] (%p28_p4) }
  0x18   : > { %138 = vst [vmem:[%s109_s24 + $0x30] sm:$0xff] %v137_v6  ;;  %140 = vst [vmem:[%s109_s24 + $0x38] sm:$0xff] %v139_v7 }
  0x19 PF: > { %p395_p7 = scmp.ge.s32.totalorder %s458_s11, 1  ;;  %p145_p8 = scmp.lt.s32.totalorder %s458_s11, 3 }
  0x1b   : > { %p146_p9 = pnand %p395_p7, %p145_p8 }
  0x1c   : > { %v253_v8 = vld [vmem:[%s611_s1 + $0x10] sm:$0xff] (!%p146_p9)  ;;  %v251_v9 = vld [vmem:[%s611_s1] sm:$0xff] (!%p146_p9)  ;;  %v460_v10 = vmov (!%p146_p9), 0   ;;  %v254_v11 = vld [vmem:[%s611_s1 + $0x18] sm:$0xff] (!%p146_p9)  ;;  %s152_s5 = sand.u32 (!%p146_p9), 1, %s450_s9  }
  0x1d   : > { %149 = sbr.rel (%p146_p9) target bundleno = 174 (0xae), region = 47  ;;  %431 = vset.pattern.permute.xlu1 (!%p146_p9), %v460_v10  ;;  %430 = vset.pattern.permute.xlu0 (!%p146_p9), %v460_v10  ;;  %v252_v12 = vld [vmem:[%s611_s1 + $0x8] sm:$0xff] (!%p146_p9)  ;;  %s531_s6 = sshll.u32 (!%p146_p9), %s152_s5, 6 }
  0x1e   : > { %267 = vperm.xlu1 (!%p146_p9), %431, %v253_v8   ;;  %257 = vperm.xlu0 (!%p146_p9), %430, %v251_v9   ;;  %s154_s7 = scalar_lea.vmem (!%p146_p9), [#allocation2], %s531_s6  ;;  %s575_s8 = scalar_lea.vmem (!%p146_p9), [#allocation3], %s531_s6 }
  0x1f   : > { %v534_v13 = vld [vmem:[%s154_s7] sm:$0xff] (!%p146_p9)  ;;  %v536_v14 = vld [vmem:[%s154_s7 + $0x10] sm:$0xff] (!%p146_p9)  ;;  %v538_v15 = vld [vmem:[%s154_s7 + $0x8] sm:$0xff] (!%p146_p9) }
  0x20   : > { %v540_v16 = vld [vmem:[%s154_s7 + $0x18] sm:$0xff] (!%p146_p9)  ;;  %v182_v17 = vadd.f32 (!%p146_p9), %v536_v14, %v534_v13  ;;  %v544_v18 = vld [vmem:[%s154_s7 + $0x20] sm:$0xff] (!%p146_p9)  ;;  %v548_v20 = vld [vmem:[%s154_s7 + $0x28] sm:$0xff] (!%p146_p9) }
  0x21   : > { %v191_v19 = vadd.f32 (!%p146_p9), %v540_v16, %v538_v15  ;;  %v551_v22 = vld [vmem:[%s154_s7 + $0x30] sm:$0xff] (!%p146_p9)  ;;  %v554_v24 = vld [vmem:[%s154_s7 + $0x38] sm:$0xff] (!%p146_p9) }
  0x22   : > { %272 = vperm.xlu1 (!%p146_p9), %431, %v254_v11   ;;  %262 = vperm.xlu0 (!%p146_p9), %430, %v252_v12   ;;  %v183_v21 = vadd.f32 (!%p146_p9), %v182_v17, %v544_v18 }
  0x23   : > { %v192_v23 = vadd.f32 (!%p146_p9), %v191_v19, %v548_v20 }
  0x24   : > { %v184_v25 = vadd.f32 %v183_v21, %v551_v22  ;;  %s404_s9 = sshll.u32 (%p506_p5), %s388_s12, 4 }
  0x25   : > { %v193_v26 = vadd.f32 %v192_v23, %v554_v24  ;;  %s300_s18 = scalar_lea.vmem (%p506_p5), %s612_s2, %s404_s9 }
  0x26   : > { %v185_v27 = vrot.slane %v184_v25, 4 }
  0x27   : > { %v194_v28 = vrot.slane %v193_v26, 4 }
  0x28   : > { %v186_v29 = vadd.f32 %v185_v27, %v184_v25 }
  0x29   : > { %v195_v30 = vadd.f32 %v194_v28, %v193_v26 }
  0x2a   : > { %v187_v31 = vrot.slane %v186_v29, 2 }
  0x2b   : > { %v196_v32 = vrot.slane %v195_v30, 2 }
  0x2c   : > { %v188_v33 = vadd.f32 %v187_v31, %v186_v29 }
  0x2d   : > { %v197_v34 = vadd.f32 %v196_v32, %v195_v30 }
  0x2e   : > { %v189_v35 = vrot.slane %v188_v33, 1 }
  0x2f   : > { %v198_v36 = vrot.slane %v197_v34, 1 }
  0x30   : > { %v190_v37 = vadd.f32 %v189_v35, %v188_v33 }
  0x31   : > { %v199_v38 = vadd.f32 %v198_v36, %v197_v34 }
  0x32   : > { %v201_v39 = vmul.f32 0.03125, %v190_v37 }
  0x33   : > { %v202_v40 = vmul.f32 0.03125, %v199_v38 }
  0x34   : > { %v203_v41 = vsub.f32 %v534_v13, %v201_v39  ;;  %v205_v42 = vsub.f32 %v536_v14, %v201_v39  ;;  %v207_v45 = vsub.f32 %v544_v18, %v201_v39  ;;  %v209_v51 = vsub.f32 %v551_v22, %v201_v39 }
  0x35   : > { %v204_v43 = vsub.f32 %v538_v15, %v202_v40  ;;  %v206_v44 = vsub.f32 %v540_v16, %v202_v40  ;;  %v208_v48 = vsub.f32 %v548_v20, %v202_v40  ;;  %v210_v54 = vsub.f32 %v554_v24, %v202_v40 }
  0x36   : > { %v211_v46 = vmul.f32 %v203_v41, %v203_v41  ;;  %v213_v47 = vmul.f32 %v205_v42, %v205_v42  ;;  %v215_v52 = vmul.f32 %v207_v45, %v207_v45  ;;  %v217_v57 = vmul.f32 %v209_v51, %v209_v51 }
  0x37   : > { %v212_v49 = vmul.f32 %v204_v43, %v204_v43  ;;  %v214_v50 = vmul.f32 %v206_v44, %v206_v44  ;;  %v216_v55 = vmul.f32 %v208_v48, %v208_v48  ;;  %v218_v59 = vmul.f32 %v210_v54, %v210_v54 }
  0x38   : > { %v219_v53 = vadd.f32 %v213_v47, %v211_v46 }
  0x39   : > { %v228_v56 = vadd.f32 %v214_v50, %v212_v49 }
  0x3a   : > { %v220_v58 = vadd.f32 %v219_v53, %v215_v52 }
  0x3b   : > { %v229_v60 = vadd.f32 %v228_v56, %v216_v55 }
  0x3c   : > { %v221_v61 = vadd.f32 %v220_v58, %v217_v57 }
  0x3d   : > { %v230_v62 = vadd.f32 %v229_v60, %v218_v59 }
  0x3e   : > { %v222_v63 = vrot.slane %v221_v61, 4 }
  0x3f   : > { %v231_v0 = vrot.slane %v230_v62, 4 }
  0x40   : > { %v223_v1 = vadd.f32 %v222_v63, %v221_v61 }
  0x41   : > { %v232_v2 = vadd.f32 %v231_v0, %v230_v62 }
  0x42   : > { %v224_v3 = vrot.slane %v223_v1, 2 }
  0x43   : > { %v233_v4 = vrot.slane %v232_v2, 2 }
  0x44   : > { %v225_v5 = vadd.f32 %v224_v3, %v223_v1 }
  0x45   : > { %v234_v6 = vadd.f32 %v233_v4, %v232_v2 }
  0x46   : > { %v226_v7 = vrot.slane %v225_v5, 1 }
  0x47   : > { %v235_v8 = vrot.slane %v234_v6, 1 }
  0x48   : > { %v227_v9 = vadd.f32 %v226_v7, %v225_v5 }
  0x49   : > { %v236_v10 = vadd.f32 %v235_v8, %v234_v6 }
  0x4a   : > { %v237_v11 = vmul.f32 0.03125, %v227_v9 }
  0x4b   : > { %v238_v12 = vmul.f32 0.03125, %v236_v10 }
  0x4c   : > { %v239_v17 = vadd.f32 1e-05, %v237_v11 }
  0x4d   : > { %v240_v19 = vadd.f32 1e-05, %v238_v12 }
  0x4e   : > { %432 = vrsqrt.f32 %v239_v17 }
  0x4f   : > { %434 = vrsqrt.f32 %v240_v19 }
  0x58   : > { %v433_v21 = vpop.eup %432 }
  0x59   : > { %v435_v23 = vpop.eup %434  ;;  %v247_v25 = vmul.f32 %v433_v21, %v544_v18  ;;  %v243_v27 = vmul.f32 %v433_v21, %v534_v13  ;;  %v249_v31 = vmul.f32 %v433_v21, %v551_v22  ;;  %v245_v33 = vmul.f32 %v433_v21, %v536_v14 }
  0x5a   : > { %v248_v26 = vmul.f32 %v435_v23, %v548_v20  ;;  %v244_v28 = vmul.f32 %v435_v23, %v538_v15  ;;  %v250_v32 = vmul.f32 %v435_v23, %v554_v24  ;;  %v246_v34 = vmul.f32 %v435_v23, %v540_v16 }
  0x9d   : > { %v268_v29 = vpop.permute.xlu1 %267  ;;  %v258_v30 = vpop.permute.xlu0 %257 }
  0x9e   : > { %v279_v35 = vmul.f32 %v268_v29, %v247_v25  ;;  %v280_v36 = vmul.f32 %v268_v29, %v248_v26  ;;  %v275_v37 = vmul.f32 %v258_v30, %v243_v27  ;;  %v276_v18 = vmul.f32 %v258_v30, %v244_v28 }
  0x9f   : > { %297 = sbr.rel (!%p506_p5) target bundleno = 174 (0xae), region = 55 }
  0xa0   : > { %287 = vst [vmem:[%s575_s8 + $0x20] sm:$0xff] %v279_v35  ;;  %288 = vst [vmem:[%s575_s8 + $0x28] sm:$0xff] %v280_v36 }
  0xa1   : > { %283 = vst [vmem:[%s575_s8] sm:$0xff] %v275_v37  ;;  %284 = vst [vmem:[%s575_s8 + $0x8] sm:$0xff] %v276_v18  ;;  %v273_v13 = vpop.permute.xlu1 %272  ;;  %v263_v14 = vpop.permute.xlu0 %262 }
  0xa2   : > { %v281_v15 = vmul.f32 %v273_v13, %v249_v31  ;;  %v282_v16 = vmul.f32 %v273_v13, %v250_v32  ;;  %v277_v20 = vmul.f32 %v263_v14, %v245_v33  ;;  %v278_v22 = vmul.f32 %v263_v14, %v246_v34 }
  0xa4   : > { %289 = vst [vmem:[%s575_s8 + $0x30] sm:$0xff] %v281_v15  ;;  %290 = vst [vmem:[%s575_s8 + $0x38] sm:$0xff] %v282_v16 }
  0xa5   : > { %285 = vst [vmem:[%s575_s8 + $0x10] sm:$0xff] %v277_v20  ;;  %286 = vst [vmem:[%s575_s8 + $0x18] sm:$0xff] %v278_v22 }
  0xa7   : > { %v321_v41 = vld [vmem:[%s575_s8 + $0x20] sm:$0xff]  ;;  %v323_v42 = vld [vmem:[%s575_s8 + $0x28] sm:$0xff] }
  0xa8   : > { %v313_v24 = vld [vmem:[%s575_s8] sm:$0xff]  ;;  %v315_v38 = vld [vmem:[%s575_s8 + $0x8] sm:$0xff]  ;;  %322 = vst [vmem:[%s300_s18 + $0x40] sm:$0xff] %v321_v41  ;;  %324 = vst [vmem:[%s300_s18 + $0x48] sm:$0xff] %v323_v42 }
  0xa9   : > { %314 = vst [vmem:[%s300_s18] sm:$0xff] %v313_v24  ;;  %316 = vst [vmem:[%s300_s18 + $0x8] sm:$0xff] %v315_v38 }
  0xab   : > { %v325_v43 = vld [vmem:[%s575_s8 + $0x30] sm:$0xff]  ;;  %v327_v44 = vld [vmem:[%s575_s8 + $0x38] sm:$0xff] }
  0xac   : > { %v317_v39 = vld [vmem:[%s575_s8 + $0x10] sm:$0xff]  ;;  %v319_v40 = vld [vmem:[%s575_s8 + $0x18] sm:$0xff]  ;;  %326 = vst [vmem:[%s300_s18 + $0x60] sm:$0xff] %v325_v43  ;;  %328 = vst [vmem:[%s300_s18 + $0x68] sm:$0xff] %v327_v44 }
  0xad   : > { %318 = vst [vmem:[%s300_s18 + $0x20] sm:$0xff] %v317_v39  ;;  %320 = vst [vmem:[%s300_s18 + $0x28] sm:$0xff] %v319_v40 }
  0xae PF: > { %p9_p10 = scmp.ge.s32.totalorder %s493_s13, 4   ;;  %s614_s9 = smov %s454_s10 }
  0xaf   : > { %s615_s10 = smov %s504_s16  ;;  %s616_s11 = smov %s493_s13 }
  0xb0   :  { %11 = sbr.rel (!%p9_p10) target bundleno = 2 (0x2), region = 109 }

</bundles_post_ra>
